<compile_context>
chip_gen: v7x
topology: tpu7x:2x2x1
jax: 0.10.0
libtpu: 0.0.40
codegen_flags: <defaults>
</compile_context>

<pallas_src>
import math
import jax
import jax.numpy as jnp
from jax.experimental import pallas as pl
from jax.experimental.pallas import tpu as pltpu

_LANE = 128


def _round_up(v: int, m: int) -> int:
    return (v + m - 1) // m * m


def _f2_kernel(x_ref, w0_ref, b0_ref, w1_ref, b1_ref, w2_ref, b2_ref, o_ref):
    # Three MXU matmuls with f32 accumulation; f32 bias + ReLU epilogue on the VPU.
    z0 = jnp.dot(x_ref[...], w0_ref[...], preferred_element_type=jnp.float32) + b0_ref[...]
    a0 = jnp.maximum(z0, 0.0).astype(w1_ref.dtype)
    z1 = jnp.dot(a0, w1_ref[...], preferred_element_type=jnp.float32) + b1_ref[...]
    a1 = jnp.maximum(z1, 0.0).astype(w2_ref.dtype)
    z2 = jnp.dot(a1, w2_ref[...], preferred_element_type=jnp.float32) + b2_ref[...]
    o_ref[...] = z2.astype(o_ref.dtype)


def prepare_params(W0, b0, W1, b1, W2, b2, *, compute_dtype=jnp.float32):
    """One-time lane padding of the (static) weights/biases.

    Hidden/output dims are zero-padded to multiples of 128 so intermediates and the
    output store are lane-dense. W0's row dim stays at d (matches the unpadded x).
    Biases stay f32 (they add onto the f32 MXU accumulators).
    """
    f32 = jnp.float32
    d, h0 = W0.shape
    h1 = W1.shape[1]
    k = W2.shape[1]
    h0p, h1p, kp = (_round_up(v, _LANE) for v in (h0, h1, k))

    W0_p = jnp.zeros((d, h0p), compute_dtype).at[:, :h0].set(W0.astype(compute_dtype))
    W1_p = jnp.zeros((h0p, h1p), compute_dtype).at[:h0, :h1].set(W1.astype(compute_dtype))
    W2_p = jnp.zeros((h1p, kp), compute_dtype).at[:h1, :k].set(W2.astype(compute_dtype))
    b0_p = jnp.zeros((1, h0p), f32).at[0, :h0].set(b0.astype(f32))
    b1_p = jnp.zeros((1, h1p), f32).at[0, :h1].set(b1.astype(f32))
    b2_p = jnp.zeros((1, kp), f32).at[0, :k].set(b2.astype(f32))

    params = (W0_p, b0_p, W1_p, b1_p, W2_p, b2_p)
    logical_dims = (d, h0, h1, k)
    return params, logical_dims


def f2_forward(x, params, logical_dims, *, tile_n=None):
    """Fused F2 forward. `params` comes from prepare_params. Returns f32 (n, k)."""
    W0_p, b0_p, W1_p, b1_p, W2_p, b2_p = params
    d, h0, h1, k = logical_dims
    compute_dtype = W0_p.dtype
    itemsize = jnp.dtype(compute_dtype).itemsize
    sub = 32 // itemsize          # sublane multiple: 8 (f32) / 16 (bf16)

    n = x.shape[0]
    assert x.shape[1] == d
    h0p, h1p, kp = W0_p.shape[1], W1_p.shape[1], W2_p.shape[1]

    # Batch tiling heuristic:
    #   n <= 256         -> one tile, rows padded only to the sublane multiple
    #   256 < n <= 1024  -> 256-row tiles (>= 2 parallel grid steps for v7x dual TCs)
    #   n > 1024         -> 512 (f32) / 1024 (bf16) row tiles (amortize ~0.35us/step)
    if tile_n is None:
        if n <= 256:
            tile_n = max(sub, _round_up(n, sub))
        elif n <= 1024:
            tile_n = 256
        else:
            tile_n = 512 if itemsize >= 4 else 1024
    else:
        tile_n = max(sub, _round_up(tile_n, sub))
    n_pad = _round_up(n, tile_n)
    grid_n = n_pad // tile_n

    # Only row-pad x when needed (and cast for the bf16 path); no lane padding.
    if n_pad == n and x.dtype == compute_dtype:
        x_c = x
    elif n_pad == n:
        x_c = x.astype(compute_dtype)
    else:
        x_c = jnp.zeros((n_pad, d), compute_dtype).at[:n, :].set(x.astype(compute_dtype))

    # Advisory cost estimate from *logical* FLOPs and actual operand bytes.
    flops = 2 * n * (d * h0 + h0 * h1 + h1 * k)
    bytes_accessed = (
        x_c.size * itemsize
        + (W0_p.size + W1_p.size + W2_p.size) * itemsize
        + (b0_p.size + b1_p.size + b2_p.size) * 4
        + n_pad * kp * itemsize
    )

    out_p = pl.pallas_call(
        _f2_kernel,
        out_shape=jax.ShapeDtypeStruct((n_pad, kp), compute_dtype),
        grid_spec=pltpu.PrefetchScalarGridSpec(
            num_scalar_prefetch=0,
            grid=(grid_n,),
            in_specs=[
                pl.BlockSpec((tile_n, d), lambda i: (i, 0)),   # x tile (full 784 lanes)
                pl.BlockSpec((d, h0p), lambda i: (0, 0)),      # W0 (resident)
                pl.BlockSpec((1, h0p), lambda i: (0, 0)),      # b0
                pl.BlockSpec((h0p, h1p), lambda i: (0, 0)),    # W1
                pl.BlockSpec((1, h1p), lambda i: (0, 0)),      # b1
                pl.BlockSpec((h1p, kp), lambda i: (0, 0)),     # W2
                pl.BlockSpec((1, kp), lambda i: (0, 0)),       # b2
            ],
            out_specs=pl.BlockSpec((tile_n, kp), lambda i: (i, 0)),
        ),
        compiler_params=pltpu.CompilerParams(
            dimension_semantics=("parallel",),
        ),
        cost_estimate=pl.CostEstimate(
            flops=flops, transcendentals=0, bytes_accessed=bytes_accessed),
    )(x_c, W0_p, b0_p, W1_p, b1_p, W2_p, b2_p)

    # Slice padded rows / lanes back to (n, k); logits returned in f32.
    return out_p[:n, :k].astype(jnp.float32)


def init_params(key, d, h0, h1, k):
    # Matches F2.__init__: W_i ~ Uniform(-1/sqrt(fan_in), 1/sqrt(fan_in)), b_i = 0.
    k0, k1, k2 = jax.random.split(key, 3)
    bound0 = 1.0 / math.sqrt(d)
    bound1 = 1.0 / math.sqrt(h0)
    bound2 = 1.0 / math.sqrt(h1)
    W0 = jax.random.uniform(k0, (d, h0), jnp.float32, -bound0, bound0)
    b0 = jnp.zeros((h0,), jnp.float32)
    W1 = jax.random.uniform(k1, (h0, h1), jnp.float32, -bound1, bound1)
    b1 = jnp.zeros((h1,), jnp.float32)
    W2 = jax.random.uniform(k2, (h1, k), jnp.float32, -bound2, bound2)
    b2 = jnp.zeros((k,), jnp.float32)
    return W0, b0, W1, b1, W2, b2


def f2_reference(x, W0, b0, W1, b1, W2, b2):
    z0 = x @ W0 + b0
    a0 = jnp.maximum(z0, 0.0)
    z1 = a0 @ W1 + b1
    a1 = jnp.maximum(z1, 0.0)
    return a1 @ W2 + b2


if __name__ == "__main__":
    # MNIST-like shapes: d=784 (28x28), h0=64, h1=32, k=10.
    d, h0, h1, k = 784, 64, 32, 10

    key = jax.random.PRNGKey(0)
    key_x, key_x2, key_p = jax.random.split(key, 3)
    raw_params = init_params(key_p, d, h0, h1, k)

    # --- exact f32 path, tiny batch (single 16-row tile, no padding at all) ---
    n = 16
    x = jax.random.normal(key_x, (n, d), jnp.float32)
    ref = f2_reference(x, *raw_params)

    params_f32, dims = prepare_params(*raw_params, compute_dtype=jnp.float32)
    out_f32 = jax.block_until_ready(f2_forward(x, params_f32, dims))
    assert out_f32.shape == (n, k)
    assert jnp.allclose(out_f32, ref, atol=1e-4, rtol=1e-4)

    # --- f32 path, non-tile-multiple batch (exercises row padding + 2 grid steps) ---
    n2 = 300
    x2 = jax.random.normal(key_x2, (n2, d), jnp.float32)
    ref2 = f2_reference(x2, *raw_params)
    out2 = jax.block_until_ready(f2_forward(x2, params_f32, dims))
    assert out2.shape == (n2, k)
    assert jnp.allclose(out2, ref2, atol=1e-4, rtol=1e-4)

    # --- bf16 matmul operands with f32 accumulation (v6e/v7x fast path) ---
    params_bf16, dims_b = prepare_params(*raw_params, compute_dtype=jnp.bfloat16)
    out_bf16 = jax.block_until_ready(f2_forward(x, params_bf16, dims_b))
    assert out_bf16.shape == (n, k)
    assert jnp.allclose(out_bf16, ref, atol=1e-1, rtol=1e-1)

    print("KERNEL_OK")
</pallas_src>

<mosaic_0001>
module attributes {stable_mosaic.version = 11 : i64} {
  func.func @_f2_kernel(%arg0: i32, %arg1: memref<16x784xf32, #tpu.memory_space<vmem>>, %arg2: memref<784x128xf32, #tpu.memory_space<vmem>>, %arg3: memref<1x128xf32, #tpu.memory_space<vmem>>, %arg4: memref<128x128xf32, #tpu.memory_space<vmem>>, %arg5: memref<1x128xf32, #tpu.memory_space<vmem>>, %arg6: memref<128x128xf32, #tpu.memory_space<vmem>>, %arg7: memref<1x128xf32, #tpu.memory_space<vmem>>, %arg8: memref<16x128xf32, #tpu.memory_space<vmem>>) attributes {dimension_semantics = [#tpu.dimension_semantics<parallel>], iteration_bounds = array<i64: 1>, scalar_prefetch = 0 : i64, scratch_operands = 0 : i64, tpu.core_type = #tpu.core_type<tc>, window_params = [{transform_indices = @transform_0, window_bounds = array<i64: 16, 784>}, {pipeline_mode = #tpu.pipeline_mode<synchronous>, transform_indices = @transform_1, window_bounds = array<i64: 784, 128>}, {pipeline_mode = #tpu.pipeline_mode<synchronous>, transform_indices = @transform_2, window_bounds = array<i64: 1, 128>}, {pipeline_mode = #tpu.pipeline_mode<synchronous>, transform_indices = @transform_3, window_bounds = array<i64: 128, 128>}, {pipeline_mode = #tpu.pipeline_mode<synchronous>, transform_indices = @transform_4, window_bounds = array<i64: 1, 128>}, {pipeline_mode = #tpu.pipeline_mode<synchronous>, transform_indices = @transform_5, window_bounds = array<i64: 128, 128>}, {pipeline_mode = #tpu.pipeline_mode<synchronous>, transform_indices = @transform_6, window_bounds = array<i64: 1, 128>}, {transform_indices = @transform_7, window_bounds = array<i64: 16, 128>}]} {
    %c0 = arith.constant 0 : index
    %c0_0 = arith.constant 0 : index
    %0 = vector.load %arg1[%c0, %c0_0] : memref<16x784xf32, #tpu.memory_space<vmem>>, vector<16x784xf32>
    %c0_1 = arith.constant 0 : index
    %c0_2 = arith.constant 0 : index
    %1 = vector.load %arg2[%c0_1, %c0_2] : memref<784x128xf32, #tpu.memory_space<vmem>>, vector<784x128xf32>
    %cst = arith.constant dense<0.000000e+00> : vector<16x128xf32>
    %2 = tpu.matmul %0, %1, %cst {dimension_numbers = #tpu.dot_dimension_numbers<[1], [0], [0], [1], [0, 0, 1, 1], [], []>} : vector<16x784xf32>, vector<784x128xf32>, vector<16x128xf32> -> vector<16x128xf32>
    %c0_3 = arith.constant 0 : index
    %c0_4 = arith.constant 0 : index
    %3 = vector.load %arg3[%c0_3, %c0_4] : memref<1x128xf32, #tpu.memory_space<vmem>>, vector<1x128xf32>
    %4 = vector.broadcast %3 : vector<1x128xf32> to vector<16x128xf32>
    %5 = arith.addf %2, %4 : vector<16x128xf32>
    %cst_5 = arith.constant 0.000000e+00 : f32
    %6 = vector.broadcast %cst_5 : f32 to vector<16x128xf32>
    %7 = arith.maximumf %5, %6 : vector<16x128xf32>
    %c0_6 = arith.constant 0 : index
    %c0_7 = arith.constant 0 : index
    %8 = vector.load %arg4[%c0_6, %c0_7] : memref<128x128xf32, #tpu.memory_space<vmem>>, vector<128x128xf32>
    %cst_8 = arith.constant dense<0.000000e+00> : vector<16x128xf32>
    %9 = tpu.matmul %7, %8, %cst_8 {dimension_numbers = #tpu.dot_dimension_numbers<[1], [0], [0], [1], [0, 0, 1, 1], [], []>} : vector<16x128xf32>, vector<128x128xf32>, vector<16x128xf32> -> vector<16x128xf32>
    %c0_9 = arith.constant 0 : index
    %c0_10 = arith.constant 0 : index
    %10 = vector.load %arg5[%c0_9, %c0_10] : memref<1x128xf32, #tpu.memory_space<vmem>>, vector<1x128xf32>
    %11 = vector.broadcast %10 : vector<1x128xf32> to vector<16x128xf32>
    %12 = arith.addf %9, %11 : vector<16x128xf32>
    %cst_11 = arith.constant 0.000000e+00 : f32
    %13 = vector.broadcast %cst_11 : f32 to vector<16x128xf32>
    %14 = arith.maximumf %12, %13 : vector<16x128xf32>
    %c0_12 = arith.constant 0 : index
    %c0_13 = arith.constant 0 : index
    %15 = vector.load %arg6[%c0_12, %c0_13] : memref<128x128xf32, #tpu.memory_space<vmem>>, vector<128x128xf32>
    %cst_14 = arith.constant dense<0.000000e+00> : vector<16x128xf32>
    %16 = tpu.matmul %14, %15, %cst_14 {dimension_numbers = #tpu.dot_dimension_numbers<[1], [0], [0], [1], [0, 0, 1, 1], [], []>} : vector<16x128xf32>, vector<128x128xf32>, vector<16x128xf32> -> vector<16x128xf32>
    %c0_15 = arith.constant 0 : index
    %c0_16 = arith.constant 0 : index
    %17 = vector.load %arg7[%c0_15, %c0_16] : memref<1x128xf32, #tpu.memory_space<vmem>>, vector<1x128xf32>
    %18 = vector.broadcast %17 : vector<1x128xf32> to vector<16x128xf32>
    %19 = arith.addf %16, %18 : vector<16x128xf32>
    %c0_17 = arith.constant 0 : index
    %c0_18 = arith.constant 0 : index
    %20 = vector.load %arg8[%c0_17, %c0_18] : memref<16x128xf32, #tpu.memory_space<vmem>>, vector<16x128xf32>
    tpu.vector_store %arg8[%c0_17, %c0_18], %19 {strides = array<i32>} : memref<16x128xf32, #tpu.memory_space<vmem>>, vector<16x128xf32>,
    return
  }
  func.func @transform_0(%arg0: i32) -> (i32, i32) {
    %c0_i32 = arith.constant 0 : i32
    %c0_i32_0 = arith.constant 0 : i32
    return %arg0, %c0_i32 : i32, i32
  }
  func.func @transform_1(%arg0: i32) -> (i32, i32) {
    %c0_i32 = arith.constant 0 : i32
    %c0_i32_0 = arith.constant 0 : i32
    %c0_i32_1 = arith.constant 0 : i32
    return %c0_i32, %c0_i32_0 : i32, i32
  }
  func.func @transform_2(%arg0: i32) -> (i32, i32) {
    %c0_i32 = arith.constant 0 : i32
    %c0_i32_0 = arith.constant 0 : i32
    %c0_i32_1 = arith.constant 0 : i32
    return %c0_i32, %c0_i32_0 : i32, i32
  }
  func.func @transform_3(%arg0: i32) -> (i32, i32) {
    %c0_i32 = arith.constant 0 : i32
    %c0_i32_0 = arith.constant 0 : i32
    %c0_i32_1 = arith.constant 0 : i32
    return %c0_i32, %c0_i32_0 : i32, i32
  }
  func.func @transform_4(%arg0: i32) -> (i32, i32) {
    %c0_i32 = arith.constant 0 : i32
    %c0_i32_0 = arith.constant 0 : i32
    %c0_i32_1 = arith.constant 0 : i32
    return %c0_i32, %c0_i32_0 : i32, i32
  }
  func.func @transform_5(%arg0: i32) -> (i32, i32) {
    %c0_i32 = arith.constant 0 : i32
    %c0_i32_0 = arith.constant 0 : i32
    %c0_i32_1 = arith.constant 0 : i32
    return %c0_i32, %c0_i32_0 : i32, i32
  }
  func.func @transform_6(%arg0: i32) -> (i32, i32) {
    %c0_i32 = arith.constant 0 : i32
    %c0_i32_0 = arith.constant 0 : i32
    %c0_i32_1 = arith.constant 0 : i32
    return %c0_i32, %c0_i32_0 : i32, i32
  }
  func.func @transform_7(%arg0: i32) -> (i32, i32) {
    %c0_i32 = arith.constant 0 : i32
    %c0_i32_0 = arith.constant 0 : i32
    return %arg0, %c0_i32 : i32, i32
  }
}

</mosaic_0001>

<bundles_post_ra>
// kernel: tpu_custom_call.1
= control target key start
LH: loop header
LB: loop body
LE: loop exit
PB: predicated region body
PF: predicated region fallthrough
CT: control target
= control target key end

     0   :  { %12 = vsyncpa [#allocation3], 0  ;;  %s1393_s0 = inlined_call_operand.hbm [shape: f32[16,784], index: 0, kind: input, shape index: {}]   ;;  %s1394_s1 = inlined_call_operand.hbm [shape: f32[784,128], index: 1, kind: input, shape index: {}]   ;;  %s1395_s2 = inlined_call_operand.vmem [shape: f32[1,128], index: 2, kind: input, shape index: {}]   ;;  %s1396_s3 = inlined_call_operand.hbm [shape: f32[128,128], index: 3, kind: input, shape index: {}]   ;;  %s1397_s4 = inlined_call_operand.vmem [shape: f32[1,128], index: 4, kind: input, shape index: {}]   ;;  %s1398_s5 = inlined_call_operand.hbm [shape: f32[128,128], index: 5, kind: input, shape index: {}]   ;;  %s1399_s6 = inlined_call_operand.vmem [shape: f32[1,128], index: 6, kind: input, shape index: {}]   ;;  %s1400_s7 = inlined_call_operand.hbm [shape: f32[16,128], index: 7, kind: output, shape index: {}]  }
   0x1   :  { %13 = vsyncpa [#allocation6], 0 }
   0x2   :  { %14 = vsyncpa [#allocation9], 0 }
   0x3   :  { %15 = vsyncpa [#allocation4], 0  ;;  %s1256_s24 = smov [#allocation5]   ;;  %s1138_s28 = scalar_lea.hbm %s1394_s1, 12544 }
   0x4   :  { %s33_s25 = sshll.u32 %s1256_s24, 4  ;;  %p1139_p0 = scmp.ne.s32.totalorder %s1394_s1, %s1138_s28  ;;  %s34_s25 = int_to_ptr.vmem [resolvable:$true] %s33_s25 }
   0x5   :  { %p1142_p1 = scmp.lt.u32.totalorder %s1138_s28, %s1394_s1 }
   0x7   :  { %p1144_p2 = pnand %p1142_p1, %p1139_p0 }
   0x9   :  { %1147 = shalt.err (!%p1144_p2)
}
   0xa   :  { %s1148_s10 = scalar_lea.vmem %s34_s25, 12544  ;;  %p1153_p4 = scmp.lt.s32.totalorder %s34_s25, %s34_s25 }
   0xb   :  { %p1149_p3 = scmp.ne.s32.totalorder %s34_s25, %s1148_s10  ;;  %p1154_p5 = scmp.lt.s32.totalorder %s1148_s10, %s1148_s10 }
   0xd   :  { %p1155_p6 = por %p1154_p5, %p1153_p4 }
   0xf   :  { %p1156_p7 = pnand %p1155_p6, %p1149_p3 }
  0x11   :  { %1159 = shalt.err (!%p1156_p7)
}
  0x12   :  { %s1257_s11 = smov 128   ;;  %s1258_s12 = smov 8  }
  0x13   :  { %39 = dma.hbm_to_vmem [thread:$0]  %s1394_s1, 12544, %s34_s25, [#allocation6], %s1257_s11, %s1257_s11, %s1258_s12  }
  0x14   :  { %s1259_s15 = smov [#allocation2]   ;;  %s1160_s19 = scalar_lea.hbm %s1393_s0, 1792 }
  0x15   :  { %s21_s16 = sshll.u32 %s1259_s15, 4  ;;  %p1161_p8 = scmp.ne.s32.totalorder %s1393_s0, %s1160_s19  ;;  %s22_s16 = int_to_ptr.vmem [resolvable:$true] %s21_s16 }
  0x16   :  { %p1164_p9 = scmp.lt.u32.totalorder %s1160_s19, %s1393_s0 }
  0x18   :  { %p1166_p10 = pnand %p1164_p9, %p1161_p8 }
  0x1a   :  { %1169 = shalt.err (!%p1166_p10)
}
  0x1b   :  { %s1170_s24 = scalar_lea.vmem %s22_s16, 1792  ;;  %p1175_p12 = scmp.lt.s32.totalorder %s22_s16, %s22_s16 }
  0x1c   :  { %p1171_p11 = scmp.ne.s32.totalorder %s22_s16, %s1170_s24  ;;  %p1176_p13 = scmp.lt.s32.totalorder %s1170_s24, %s1170_s24 }
  0x1e   :  { %p1177_p0 = por %p1176_p13, %p1175_p12 }
  0x20   :  { %p1178_p1 = pnand %p1177_p0, %p1171_p11 }
  0x22   :  { %1181 = shalt.err (!%p1178_p1)
}
  0x23   :  { %s1260_s1 = smov 896   ;;  %s1261_s25 = smov 56  }
  0x24   :  { %27 = dma.hbm_to_vmem [thread:$0]  %s1393_s0, 1792, %s22_s16, [#allocation3], %s1260_s1, %s1260_s1, %s1261_s25  }
  0x25   :  { %s1262_s28 = smov [#allocation7]   ;;  %s1263_s30 = smov [#allocation8]  }
  0x26   :  { %s47_s29 = sshll.u32 %s1262_s28, 4  ;;  %s61_s8 = sshll.u32 %s1263_s30, 4  ;;  %s48_s29 = int_to_ptr.vmem [resolvable:$true] %s47_s29  ;;  %s1332_s8 = int_to_ptr.vmem [resolvable:$true] %s61_s8 }
  0x27   :  { %s1182_s13 = scalar_lea.hbm %s1396_s3, 2048 }
  0x28   :  { %p1183_p2 = scmp.ne.s32.totalorder %s1396_s3, %s1182_s13  ;;  %p1186_p3 = scmp.lt.u32.totalorder %s1182_s13, %s1396_s3 }
  0x2a   :  { %p1188_p4 = pnand %p1186_p3, %p1183_p2 }
  0x2c   :  { %1191 = shalt.err (!%p1188_p4)
}
  0x2d   :  { %s1192_s0 = scalar_lea.vmem %s48_s29, 2048  ;;  %p1197_p6 = scmp.lt.s32.totalorder %s48_s29, %s48_s29 }
  0x2e   :  { %p1193_p5 = scmp.ne.s32.totalorder %s48_s29, %s1192_s0  ;;  %p1198_p7 = scmp.lt.s32.totalorder %s1192_s0, %s1192_s0 }
  0x30   :  { %p1199_p8 = por %p1198_p7, %p1197_p6 }
  0x32   :  { %p1200_p9 = pnand %p1199_p8, %p1193_p5 }
  0x34   :  { %1203 = shalt.err (!%p1200_p9)
}
  0x35   :  { %53 = dma.hbm_to_vmem [thread:$0]  %s1396_s3, 2048, %s48_s29, [#allocation6], %s1257_s11, %s1257_s11, %s1258_s12  }
  0x36   :  { %s1204_s22 = scalar_lea.hbm %s1398_s5, 2048 }
  0x37   :  { %p1205_p10 = scmp.ne.s32.totalorder %s1398_s5, %s1204_s22  ;;  %p1208_p11 = scmp.lt.u32.totalorder %s1204_s22, %s1398_s5 }
  0x39   :  { %p1210_p12 = pnand %p1208_p11, %p1205_p10 }
  0x3b   :  { %1213 = shalt.err (!%p1210_p12)
}
  0x3c   :  { %s1214_s26 = scalar_lea.vmem %s1332_s8, 2048  ;;  %p1219_p0 = scmp.lt.s32.totalorder %s1332_s8, %s1332_s8 }
  0x3d   :  { %p1215_p13 = scmp.ne.s32.totalorder %s1332_s8, %s1214_s26  ;;  %p1220_p1 = scmp.lt.s32.totalorder %s1214_s26, %s1214_s26 }
  0x3f   :  { %p1221_p2 = por %p1220_p1, %p1219_p0 }
  0x41   :  { %p1222_p3 = pnand %p1221_p2, %p1215_p13 }
  0x43   :  { %1225 = shalt.err (!%p1222_p3)
}
  0x44   :  { %67 = dma.hbm_to_vmem [thread:$0]  %s1398_s5, 2048, %s1332_s8, [#allocation9], %s1257_s11, %s1257_s11, %s1258_s12  }
  0x45   :  { %1248 = dma.done.wait [#allocation3], 1792  }
  0x46   :  { %1249 = vsyncadd [#allocation3], 4294965504 }
  0x47   :  { %1250 = dma.done.wait [#allocation6], 14592  }
  0x48   :  { %1251 = vsyncadd [#allocation6], 4294952704 }
  0x49   :  { %1252 = dma.done.wait [#allocation9], 2048  }
  0x4a   :  { %1253 = vsyncadd [#allocation9], 4294965248  ;;  %v112_v0 = vld [vmem:[#allocation5 + $0x80] sm:$0xff]  ;;  %v113_v1 = vld [vmem:[#allocation5 + $0x88] sm:$0xff]  ;;  %vm201_vm0 = vcmask 130048   ;;  %s1264_s9 = smov [#allocation10]  }
  0x4b   :  { %v96_v2 = vld [vmem:[#allocation5] sm:$0xff]  ;;  %v965_v3 = vpack.c.bf16 %v113_v1, %v112_v0  ;;  %v97_v4 = vld [vmem:[#allocation5 + $0x8] sm:$0xff]  ;;  %v114_v11 = vld [vmem:[#allocation5 + $0x90] sm:$0xff]  ;;  %s715_s10 = sshll.u32 %s1264_s9, 4  ;;  %s716_s10 = int_to_ptr.vmem [resolvable:$true] %s715_s10 }
  0x4c   :  { %v144_v5 = vld [vmem:[#allocation5 + $0x180] sm:$0xff]  ;;  %v145_v6 = vld [vmem:[#allocation5 + $0x188] sm:$0xff]  ;;  %v967_v7 = vpack.c.bf16 %v97_v4, %v96_v2  ;;  %v115_v13 = vld [vmem:[#allocation5 + $0x98] sm:$0xff]  ;;  %p1231_p5 = scmp.lt.s32.totalorder %s716_s10, %s716_s10 }
  0x4d   :  { %v997_v8 = vpack.c.bf16 %v145_v6, %v144_v5  ;;  %v128_v9 = vld [vmem:[#allocation5 + $0x100] sm:$0xff]  ;;  %v129_v10 = vld [vmem:[#allocation5 + $0x108] sm:$0xff]  ;;  %966 = vmatprep.subr.bf16.mxu0 %v965_v3  ;;  %v98_v14 = vld [vmem:[#allocation5 + $0x10] sm:$0xff]  ;;  %v969_v16 = vpack.c.bf16 %v115_v13, %v114_v11 }
  0x4e   :  { %v999_v12 = vpack.c.bf16 %v129_v10, %v128_v9  ;;  %v99_v15 = vld [vmem:[#allocation5 + $0x18] sm:$0xff]  ;;  %968 = vmatpush3.bf16.msra.mxu0 %v967_v7  ;;  %v146_v18 = vld [vmem:[#allocation5 + $0x190] sm:$0xff]  ;;  %v116_v23 = vld [vmem:[#allocation5 + $0xa0] sm:$0xff] }
  0x4f   :  { %998 = vmatprep.subr.bf16.mxu1 %v997_v8  ;;  %v971_v17 = vpack.c.bf16 %v99_v15, %v98_v14  ;;  %v147_v19 = vld [vmem:[#allocation5 + $0x198] sm:$0xff]  ;;  %v130_v20 = vld [vmem:[#allocation5 + $0x110] sm:$0xff]  ;;  %v117_v24 = vld [vmem:[#allocation5 + $0xa8] sm:$0xff]  ;;  %970 = vmatprep.subr.bf16.mxu0 %v969_v16 }
  0x50   :  { %1000 = vmatpush3.bf16.msra.mxu1 %v999_v12  ;;  %v1001_v21 = vpack.c.bf16 %v147_v19, %v146_v18  ;;  %v131_v22 = vld [vmem:[#allocation5 + $0x118] sm:$0xff]  ;;  %v973_v26 = vpack.c.bf16 %v117_v24, %v116_v23  ;;  %v100_v27 = vld [vmem:[#allocation5 + $0x20] sm:$0xff]  ;;  %v101_v28 = vld [vmem:[#allocation5 + $0x28] sm:$0xff] }
  0x51   :  { %v1003_v25 = vpack.c.bf16 %v131_v22, %v130_v20  ;;  %v148_v29 = vld [vmem:[#allocation5 + $0x1a0] sm:$0xff]  ;;  %v149_v30 = vld [vmem:[#allocation5 + $0x1a8] sm:$0xff]  ;;  %v975_v33 = vpack.c.bf16 %v101_v28, %v100_v27  ;;  %v118_v35 = vld [vmem:[#allocation5 + $0xb0] sm:$0xff] }
  0x52   :  { %1002 = vmatprep.subr.bf16.mxu1 %v1001_v21  ;;  %v132_v31 = vld [vmem:[#allocation5 + $0x120] sm:$0xff]  ;;  %v133_v32 = vld [vmem:[#allocation5 + $0x128] sm:$0xff]  ;;  %972 = vmatpush3.bf16.msra.mxu0 %v971_v17  ;;  %v1005_v34 = vpack.c.bf16 %v149_v30, %v148_v29  ;;  %v119_v36 = vld [vmem:[#allocation5 + $0xb8] sm:$0xff] }
  0x53   :  { %v102_v37 = vld [vmem:[#allocation5 + $0x30] sm:$0xff]  ;;  %974 = vmatprep.subr.bf16.mxu0 %v973_v26  ;;  %v1007_v38 = vpack.c.bf16 %v133_v32, %v132_v31  ;;  %v977_v39 = vpack.c.bf16 %v119_v36, %v118_v35  ;;  %v103_v40 = vld [vmem:[#allocation5 + $0x38] sm:$0xff]  ;;  %v120_v46 = vld [vmem:[#allocation5 + $0xc0] sm:$0xff] }
  0x54   :  { %1004 = vmatpush3.bf16.msra.mxu1 %v1003_v25  ;;  %v150_v41 = vld [vmem:[#allocation5 + $0x1b0] sm:$0xff]  ;;  %v151_v42 = vld [vmem:[#allocation5 + $0x1b8] sm:$0xff]  ;;  %v121_v47 = vld [vmem:[#allocation5 + $0xc8] sm:$0xff]  ;;  %v979_v48 = vpack.c.bf16 %v103_v40, %v102_v37 }
  0x55   :  { %1006 = vmatprep.subr.bf16.mxu1 %v1005_v34  ;;  %v1009_v43 = vpack.c.bf16 %v151_v42, %v150_v41  ;;  %v134_v44 = vld [vmem:[#allocation5 + $0x130] sm:$0xff]  ;;  %v135_v45 = vld [vmem:[#allocation5 + $0x138] sm:$0xff]  ;;  %v152_v49 = vld [vmem:[#allocation5 + $0x1c0] sm:$0xff]  ;;  %v981_v52 = vpack.c.bf16 %v121_v47, %v120_v46 }
  0x56   :  { %976 = vmatpush3.bf16.msra.mxu0 %v975_v33  ;;  %v153_v50 = vld [vmem:[#allocation5 + $0x1c8] sm:$0xff]  ;;  %v1011_v51 = vpack.c.bf16 %v135_v45, %v134_v44  ;;  %v104_v53 = vld [vmem:[#allocation5 + $0x40] sm:$0xff]  ;;  %v122_v58 = vld [vmem:[#allocation5 + $0xd0] sm:$0xff] }
  0x57   :  { %978 = vmatprep.subr.bf16.mxu0 %v977_v39  ;;  %v105_v54 = vld [vmem:[#allocation5 + $0x48] sm:$0xff]  ;;  %v136_v55 = vld [vmem:[#allocation5 + $0x140] sm:$0xff]  ;;  %v1013_v56 = vpack.c.bf16 %v153_v50, %v152_v49  ;;  %v123_v59 = vld [vmem:[#allocation5 + $0xd8] sm:$0xff] }
  0x58   :  { %1008 = vmatpush3.bf16.msra.mxu1 %v1007_v38  ;;  %v137_v57 = vld [vmem:[#allocation5 + $0x148] sm:$0xff]  ;;  %v154_v60 = vld [vmem:[#allocation5 + $0x1d0] sm:$0xff]  ;;  %v155_v61 = vld [vmem:[#allocation5 + $0x1d8] sm:$0xff]  ;;  %v983_v62 = vpack.c.bf16 %v105_v54, %v104_v53  ;;  %v985_v0 = vpack.c.bf16 %v123_v59, %v122_v58 }
  0x59   :  { %1010 = vmatprep.subr.bf16.mxu1 %v1009_v43  ;;  %v1015_v63 = vpack.c.bf16 %v137_v57, %v136_v55  ;;  %v106_v1 = vld [vmem:[#allocation5 + $0x50] sm:$0xff]  ;;  %v107_v2 = vld [vmem:[#allocation5 + $0x58] sm:$0xff]  ;;  %v1017_v4 = vpack.c.bf16 %v155_v61, %v154_v60  ;;  %v124_v6 = vld [vmem:[#allocation5 + $0xe0] sm:$0xff] }
  0x5a   :  { %980 = vmatpush3.bf16.msra.mxu0 %v979_v48  ;;  %v138_v3 = vld [vmem:[#allocation5 + $0x150] sm:$0xff]  ;;  %v139_v5 = vld [vmem:[#allocation5 + $0x158] sm:$0xff]  ;;  %v125_v7 = vld [vmem:[#allocation5 + $0xe8] sm:$0xff]  ;;  %v987_v10 = vpack.c.bf16 %v107_v2, %v106_v1 }
  0x5b   :  { %982 = vmatprep.subr.bf16.mxu0 %v981_v52  ;;  %v156_v8 = vld [vmem:[#allocation5 + $0x1e0] sm:$0xff]  ;;  %v157_v9 = vld [vmem:[#allocation5 + $0x1e8] sm:$0xff]  ;;  %v83_v12 = vld [vmem:[#allocation2 + $0x8] sm:$0xff]  ;;  %v1019_v13 = vpack.c.bf16 %v139_v5, %v138_v3  ;;  %v989_v14 = vpack.c.bf16 %v125_v7, %v124_v6 }
  0x5c   :  { %1012 = vmatpush3.bf16.msra.mxu1 %v1011_v51  ;;  %v108_v11 = vld [vmem:[#allocation5 + $0x60] sm:$0xff]  ;;  %v109_v15 = vld [vmem:[#allocation5 + $0x68] sm:$0xff]  ;;  %v1021_v18 = vpack.c.bf16 %v157_v9, %v156_v8  ;;  %v126_v19 = vld [vmem:[#allocation5 + $0xf0] sm:$0xff]  ;;  %272 = vmatprep.mubr.f32.mxu0 %v83_v12 }
  0x5d   :  { %1014 = vmatprep.subr.bf16.mxu1 %v1013_v56  ;;  %v140_v16 = vld [vmem:[#allocation5 + $0x160] sm:$0xff]  ;;  %v141_v17 = vld [vmem:[#allocation5 + $0x168] sm:$0xff]  ;;  %v127_v20 = vld [vmem:[#allocation5 + $0xf8] sm:$0xff]  ;;  %v991_v24 = vpack.c.bf16 %v109_v15, %v108_v11 }
  0x5e   :  { %984 = vmatpush3.bf16.msra.mxu0 %v983_v62  ;;  %v85_v21 = vld [vmem:[#allocation2 + $0x18] sm:$0xff]  ;;  %v158_v22 = vld [vmem:[#allocation5 + $0x1f0] sm:$0xff]  ;;  %v159_v23 = vld [vmem:[#allocation5 + $0x1f8] sm:$0xff]  ;;  %v1023_v25 = vpack.c.bf16 %v141_v17, %v140_v16  ;;  %v993_v26 = vpack.c.bf16 %v127_v20, %v126_v19 }
  0x5f   :  { %986 = vmatprep.subr.bf16.mxu0 %v985_v0  ;;  %347 = vmatprep.mubr.f32.mxu1 %v85_v21  ;;  %v110_v27 = vld [vmem:[#allocation5 + $0x70] sm:$0xff]  ;;  %v111_v28 = vld [vmem:[#allocation5 + $0x78] sm:$0xff]  ;;  %v1025_v30 = vpack.c.bf16 %v159_v23, %v158_v22  ;;  %v176_v32 = vld [vmem:[#allocation5 + $0x280] sm:$0xff] }
  0x60   :  { %1016 = vmatpush3.bf16.msra.mxu1 %v1015_v63  ;;  %v142_v29 = vld [vmem:[#allocation5 + $0x170] sm:$0xff]  ;;  %v143_v31 = vld [vmem:[#allocation5 + $0x178] sm:$0xff]  ;;  %v177_v33 = vld [vmem:[#allocation5 + $0x288] sm:$0xff]  ;;  %v995_v34 = vpack.c.bf16 %v111_v28, %v110_v27 }
  0x61   :  { %1018 = vmatprep.subr.bf16.mxu1 %v1017_v4  ;;  %v1027_v35 = vpack.c.bf16 %v143_v31, %v142_v29  ;;  %v1029_v36 = vpack.c.bf16 %v177_v33, %v176_v32  ;;  %v160_v37 = vld [vmem:[#allocation5 + $0x200] sm:$0xff]  ;;  %v161_v38 = vld [vmem:[#allocation5 + $0x208] sm:$0xff]  ;;  %v178_v39 = vld [vmem:[#allocation5 + $0x290] sm:$0xff] }
  0x62   :  { %988 = vmatpush3.bf16.msra.mxu0 %v987_v10  ;;  %v179_v40 = vld [vmem:[#allocation5 + $0x298] sm:$0xff]  ;;  %v82_v41 = vld [vmem:[#allocation2] sm:$0xff]  ;;  %v1031_v42 = vpack.c.bf16 %v161_v38, %v160_v37  ;;  %v84_v43 = vld [vmem:[#allocation2 + $0x10] sm:$0xff] }
  0x63   :  { %990 = vmatprep.subr.bf16.mxu0 %v989_v14  ;;  %v1033_v44 = vpack.c.bf16 %v179_v40, %v178_v39  ;;  %v162_v45 = vld [vmem:[#allocation5 + $0x210] sm:$0xff]  ;;  %v163_v46 = vld [vmem:[#allocation5 + $0x218] sm:$0xff]  ;;  %v180_v47 = vld [vmem:[#allocation5 + $0x2a0] sm:$0xff] }
  0x64   :  { %1020 = vmatpush3.bf16.msra.mxu1 %v1019_v13  ;;  %v181_v48 = vld [vmem:[#allocation5 + $0x2a8] sm:$0xff]  ;;  %v90_v49 = vld [vmem:[#allocation2 + $0x40] sm:$0xff]  ;;  %v192_v50 = vld [vmem:[#allocation5 + $0x300] sm:$0xff]  ;;  %v1035_v53 = vpack.c.bf16 %v163_v46, %v162_v45 }
  0x65   :  { %1022 = vmatprep.subr.bf16.mxu1 %v1021_v18  ;;  %v92_v51 = vld [vmem:[#allocation2 + $0x50] sm:$0xff]  ;;  %v193_v52 = vld [vmem:[#allocation5 + $0x308] sm:$0xff]  ;;  %v1037_v56 = vpack.c.bf16 %v181_v48, %v180_v47  ;;  %v91_v59 = vld [vmem:[#allocation2 + $0x48] sm:$0xff] }
  0x66   :  { %992 = vmatpush3.bf16.msra.mxu0 %v991_v24  ;;  %v89_v54 = vld [vmem:[#allocation2 + $0x38] sm:$0xff]  ;;  %v1061_v55 = vpack.c.bf16 %v193_v52, %v192_v50  ;;  %v164_v57 = vld [vmem:[#allocation5 + $0x220] sm:$0xff]  ;;  %v182_v60 = vld [vmem:[#allocation5 + $0x2b0] sm:$0xff] }
  0x67   :  { %994 = vmatprep.subr.bf16.mxu0 %v993_v26  ;;  %v165_v58 = vld [vmem:[#allocation5 + $0x228] sm:$0xff]  ;;  %v183_v61 = vld [vmem:[#allocation5 + $0x2b8] sm:$0xff]  ;;  %v88_v63 = vld [vmem:[#allocation2 + $0x30] sm:$0xff] }
  0x68   :  { %1024 = vmatpush3.bf16.msra.mxu1 %v1023_v25  ;;  %v87_v62 = vld [vmem:[#allocation2 + $0x28] sm:$0xff]  ;;  %v1039_v0 = vpack.c.bf16 %v165_v58, %v164_v57  ;;  %v1041_v1 = vpack.c.bf16 %v183_v61, %v182_v60  ;;  %v166_v2 = vld [vmem:[#allocation5 + $0x230] sm:$0xff]  ;;  %v184_v5 = vld [vmem:[#allocation5 + $0x2c0] sm:$0xff] }
  0x69   :  { %1026 = vmatprep.subr.bf16.mxu1 %v1025_v30  ;;  %v167_v3 = vld [vmem:[#allocation5 + $0x238] sm:$0xff]  ;;  %v185_v6 = vld [vmem:[#allocation5 + $0x2c8] sm:$0xff]  ;;  %v168_v9 = vld [vmem:[#allocation5 + $0x240] sm:$0xff] }
  0x6a   :  { %996 = vmatpush3.bf16.msra.mxu0 %v995_v34  ;;  %v95_v4 = vld [vmem:[#allocation2 + $0x68] sm:$0xff]  ;;  %v1043_v7 = vpack.c.bf16 %v167_v3, %v166_v2  ;;  %v1045_v8 = vpack.c.bf16 %v185_v6, %v184_v5  ;;  %v169_v10 = vld [vmem:[#allocation5 + $0x248] sm:$0xff]  ;;  %v186_v11 = vld [vmem:[#allocation5 + $0x2d0] sm:$0xff] }
  0x6b   :  { %1030 = vmatprep.subr.bf16.mxu0 %v1029_v36  ;;  %v187_v12 = vld [vmem:[#allocation5 + $0x2d8] sm:$0xff]  ;;  %v1047_v13 = vpack.c.bf16 %v169_v10, %v168_v9  ;;  %v170_v15 = vld [vmem:[#allocation5 + $0x250] sm:$0xff]  ;;  %v188_v17 = vld [vmem:[#allocation5 + $0x2e0] sm:$0xff] }
  0x6c   :  { %1028 = vmatpush3.bf16.msra.mxu1 %v1027_v35  ;;  %v1049_v14 = vpack.c.bf16 %v187_v12, %v186_v11  ;;  %v171_v16 = vld [vmem:[#allocation5 + $0x258] sm:$0xff]  ;;  %v189_v18 = vld [vmem:[#allocation5 + $0x2e8] sm:$0xff]  ;;  %v172_v21 = vld [vmem:[#allocation5 + $0x260] sm:$0xff] }
  0x6d   :  { %273 = vmatmul.mubr.f32.vlgmr.msra.gmra.mrb[0].mxu0 %v82_v41  ;;  %1062 = vmatprep.subr.bf16.mxu1 %v1061_v55  ;;  %v1051_v19 = vpack.c.bf16 %v171_v16, %v170_v15  ;;  %v1053_v20 = vpack.c.bf16 %v189_v18, %v188_v17  ;;  %v173_v22 = vld [vmem:[#allocation5 + $0x268] sm:$0xff]  ;;  %v190_v23 = vld [vmem:[#allocation5 + $0x2f0] sm:$0xff]  ;;  %v191_v24 = vld [vmem:[#allocation5 + $0x2f8] sm:$0xff] }
  0x6e   :  { %1032 = vmatpush3.bf16.msra.mxu0 %v1031_v42  ;;  %277 = vmatprep.mubr.f32.mxu0 %v90_v49  ;;  %v1055_v25 = vpack.c.bf16 %v173_v22, %v172_v21  ;;  %v1057_v26 = vpack.c.bf16 %v191_v24, %v190_v23  ;;  %v174_v27 = vld [vmem:[#allocation5 + $0x270] sm:$0xff]  ;;  %v175_v28 = vld [vmem:[#allocation5 + $0x278] sm:$0xff]  ;;  %v93_v32 = vld [vmem:[#allocation2 + $0x58] sm:$0xff] }
  0x6f   :  { %348 = vmatmul.mubr.f32.vlgmr.msra.gmra.mrb[0].mxu1 %v84_v43  ;;  %1034 = vmatprep.subr.bf16.mxu0 %v1033_v44  ;;  %v1059_v29 = vpack.c.bf16 %v175_v28, %v174_v27  ;;  %v86_v30 = vld [vmem:[#allocation2 + $0x20] sm:$0xff]  ;;  %v511_v34 = vld [vmem:[#allocation7 + $0x8] sm:$0xff]  ;;  %v512_v35 = vld [vmem:[#allocation7 + $0x10] sm:$0xff] }
  0x70   :  { %352 = vmatprep.mubr.f32.mxu1 %v92_v51  ;;  %1064 = vmatpush3.bf16.msra.mxu1 %v1061_v55  ;;  %v94_v31 = vld [vmem:[#allocation2 + $0x60] sm:$0xff]  ;;  %v513_v37 = vld [vmem:[#allocation7 + $0x18] sm:$0xff]  ;;  %v515_v40 = vld [vmem:[#allocation7 + $0x28] sm:$0xff] }
  0x71   :  { %278 = vmatmul.mubr.f32.gmra.mrb[2].mxu0 %v89_v54  ;;  %v510_v33 = vld [vmem:[#allocation7] sm:$0xff]  ;;  %v1069_v38 = vpack.c.bf16 %v513_v37, %v512_v35  ;;  %v516_v42 = vld [vmem:[#allocation7 + $0x30] sm:$0xff]  ;;  %v517_v43 = vld [vmem:[#allocation7 + $0x38] sm:$0xff] }
  0x72   :  { %1036 = vmatpush3.bf16.msra.mxu0 %v1035_v53  ;;  %422 = vmatprep.mubr.f32.mxu0 %v87_v62  ;;  %v1065_v36 = vpack.c.bf16 %v511_v34, %v510_v33  ;;  %v514_v39 = vld [vmem:[#allocation7 + $0x20] sm:$0xff]  ;;  %v1077_v44 = vpack.c.bf16 %v517_v43, %v516_v42  ;;  %v519_v46 = vld [vmem:[#allocation7 + $0x48] sm:$0xff]  ;;  %v520_v48 = vld [vmem:[#allocation7 + $0x50] sm:$0xff] }
  0x73   :  { %353 = vmatmul.mubr.f32.gmra.mrb[2].mxu1 %v91_v59  ;;  %1038 = vmatprep.subr.bf16.mxu0 %v1037_v56  ;;  %v1073_v41 = vpack.c.bf16 %v515_v40, %v514_v39  ;;  %v518_v45 = vld [vmem:[#allocation7 + $0x40] sm:$0xff]  ;;  %v521_v49 = vld [vmem:[#allocation7 + $0x58] sm:$0xff]  ;;  %v523_v52 = vld [vmem:[#allocation7 + $0x68] sm:$0xff] }
  0x74   :  { %892 = vmatprep.mubr.msk.f32.mxu1 %vm201_vm0, %v88_v63  ;;  %1066 = vmatprep.subr.bf16.mxu1 %v1065_v36  ;;  %v1081_v47 = vpack.c.bf16 %v519_v46, %v518_v45  ;;  %v1085_v50 = vpack.c.bf16 %v521_v49, %v520_v48  ;;  %v522_v51 = vld [vmem:[#allocation7 + $0x60] sm:$0xff]  ;;  %v524_v54 = vld [vmem:[#allocation7 + $0x70] sm:$0xff]  ;;  %v525_v55 = vld [vmem:[#allocation7 + $0x78] sm:$0xff] }
  0x75   :  { %v1089_v53 = vpack.c.bf16 %v523_v52, %v522_v51  ;;  %v1093_v56 = vpack.c.bf16 %v525_v55, %v524_v54  ;;  %v610_v57 = vld [vmem:[#allocation8] sm:$0xff]  ;;  %v611_v58 = vld [vmem:[#allocation8 + $0x8] sm:$0xff]  ;;  %v612_v59 = vld [vmem:[#allocation8 + $0x10] sm:$0xff] }
  0x76   :  { %1040 = vmatpush3.bf16.msra.mxu0 %v1039_v0  ;;  %v1097_v60 = vpack.c.bf16 %v611_v58, %v610_v57  ;;  %v613_v61 = vld [vmem:[#allocation8 + $0x18] sm:$0xff]  ;;  %v614_v63 = vld [vmem:[#allocation8 + $0x20] sm:$0xff]  ;;  %v615_v0 = vld [vmem:[#allocation8 + $0x28] sm:$0xff] }
  0x77   :  { %893 = vmatmul.mubr.msk.f32.vlgmr.msra.gmra.mrb[4].mxu1 %vm201_vm0, %v95_v4  ;;  %1042 = vmatprep.subr.bf16.mxu0 %v1041_v1  ;;  %v1101_v62 = vpack.c.bf16 %v613_v61, %v612_v59  ;;  %v1105_v1 = vpack.c.bf16 %v615_v0, %v614_v63  ;;  %v616_v2 = vld [vmem:[#allocation8 + $0x30] sm:$0xff]  ;;  %v617_v3 = vld [vmem:[#allocation8 + $0x38] sm:$0xff]  ;;  %v618_v5 = vld [vmem:[#allocation8 + $0x40] sm:$0xff] }
  0x78   :  { %1068 = vmatpush3.bf16.msra.mxu1 %v1065_v36  ;;  %v1109_v4 = vpack.c.bf16 %v617_v3, %v616_v2  ;;  %v619_v6 = vld [vmem:[#allocation8 + $0x48] sm:$0xff]  ;;  %v621_v9 = vld [vmem:[#allocation8 + $0x58] sm:$0xff]  ;;  %v622_v11 = vld [vmem:[#allocation8 + $0x60] sm:$0xff] }
  0x79   :  { %1070 = vmatprep.subr.bf16.mxu1 %v1069_v38  ;;  %v623_v12 = vld [vmem:[#allocation8 + $0x68] sm:$0xff]  ;;  %v729_v15 = vld [vmem:[%s1395_s2] ss:$0 sm:$0xff]  ;;  %v624_v45 = vld [vmem:[#allocation8 + $0x70] sm:$0xff] }
  0x7a   :  { %1044 = vmatpush3.bf16.msra.mxu0 %v1043_v7  ;;  %v1113_v7 = vpack.c.bf16 %v619_v6, %v618_v5  ;;  %v625_v46 = vld [vmem:[#allocation8 + $0x78] sm:$0xff]  ;;  %v732_v48 = vld [vmem:[%s1397_s4] ss:$0 sm:$0xff]  ;;  %s1226_s4 = scalar_lea.vmem %s716_s10, 256 }
  0x7b   :  { %1046 = vmatprep.subr.bf16.mxu0 %v1045_v8  ;;  %v620_v8 = vld [vmem:[#allocation8 + $0x50] sm:$0xff]  ;;  %v733_v55 = vld [vmem:[%s1399_s6] ss:$0 sm:$0xff]  ;;  %p1227_p4 = scmp.ne.s32.totalorder %s716_s10, %s1226_s4  ;;  %p1232_p6 = scmp.lt.s32.totalorder %s1226_s4, %s1226_s4 }
  0x7c   :  { %1072 = vmatpush3.bf16.msra.mxu1 %v1069_v38  ;;  %v1117_v10 = vpack.c.bf16 %v621_v9, %v620_v8 }
  0x7d   :  { %1074 = vmatprep.subr.bf16.mxu1 %v1073_v41  ;;  %p1233_p7 = por %p1232_p6, %p1231_p5 }
  0x7e   :  { %1048 = vmatpush3.bf16.msra.mxu0 %v1047_v13  ;;  %v1121_v13 = vpack.c.bf16 %v623_v12, %v622_v11 }
  0x7f   :  { %1050 = vmatprep.subr.bf16.mxu0 %v1049_v14  ;;  %p1234_p8 = pnand %p1233_p7, %p1227_p4 }
  0x80   :  { %1076 = vmatpush3.bf16.msra.mxu1 %v1073_v41 }
  0x81   :  { %1078 = vmatprep.subr.bf16.mxu1 %v1077_v44 }
  0x82   :  { %1052 = vmatpush3.bf16.msra.mxu0 %v1051_v19 }
  0x83   :  { %1054 = vmatprep.subr.bf16.mxu0 %v1053_v20 }
  0x84   :  { %1080 = vmatpush3.bf16.msra.mxu1 %v1077_v44 }
  0x85   :  { %1082 = vmatprep.subr.bf16.mxu1 %v1081_v47 }
  0x86   :  { %1056 = vmatpush3.bf16.msra.mxu0 %v1055_v25 }
  0x87   :  { %1058 = vmatprep.subr.bf16.mxu0 %v1057_v26 }
  0x88   :  { %1084 = vmatpush3.bf16.msra.mxu1 %v1081_v47  ;;  %v1125_v47 = vpack.c.bf16 %v625_v46, %v624_v45 }
  0x89   :  { %1086 = vmatprep.subr.bf16.mxu1 %v1085_v50 }
  0x8a   :  { %1060 = vmatpush3.bf16.msra.mxu0 %v1059_v29 }
  0x8b   :  { %1098 = vmatprep.subr.bf16.mxu0 %v1097_v60 }
  0x8c   :  { %1088 = vmatpush3.bf16.msra.mxu1 %v1085_v50 }
  0x8d   :  { %423 = vmatmul.mubr.f32.vlgmr.msra.gmra.mrb[4].mxu0 %v86_v30  ;;  %1090 = vmatprep.subr.bf16.mxu1 %v1089_v53 }
  0x8e   :  { %427 = vmatprep.mubr.f32.mxu0 %v94_v31  ;;  %1100 = vmatpush3.bf16.msra.mxu0 %v1097_v60 }
  0x8f   :  { %1102 = vmatprep.subr.bf16.mxu0 %v1101_v62 }
  0x90   :  { %1092 = vmatpush3.bf16.msra.mxu1 %v1089_v53 }
  0x91   :  { %428 = vmatmul.mubr.f32.gmra.mrb[6].mxu0 %v93_v32  ;;  %1094 = vmatprep.subr.bf16.mxu1 %v1093_v56 }
  0x92   :  { %1104 = vmatpush3.bf16.msra.mxu0 %v1101_v62 }
  0x93   :  { %1106 = vmatprep.subr.bf16.mxu0 %v1105_v1 }
  0x94   :  { %1096 = vmatpush3.bf16.msra.mxu1 %v1093_v56 }
  0x96   :  { %1108 = vmatpush3.bf16.msra.mxu0 %v1105_v1 }
  0x97   :  { %1110 = vmatprep.subr.bf16.mxu0 %v1109_v4 }
  0x9a   :  { %1112 = vmatpush3.bf16.msra.mxu0 %v1109_v4 }
  0x9b   :  { %1114 = vmatprep.subr.bf16.mxu0 %v1113_v7 }
  0x9e   :  { %1116 = vmatpush3.bf16.msra.mxu0 %v1113_v7 }
  0x9f   :  { %1118 = vmatprep.subr.bf16.mxu0 %v1117_v10 }
  0xa2   :  { %1120 = vmatpush3.bf16.msra.mxu0 %v1117_v10 }
  0xa3   :  { %1122 = vmatprep.subr.bf16.mxu0 %v1121_v13 }
  0xa6   :  { %1124 = vmatpush3.bf16.msra.mxu0 %v1121_v13 }
  0xa7   :  { %1126 = vmatprep.subr.bf16.mxu0 %v1125_v47 }
  0xaa   :  { %1128 = vmatpush3.bf16.msra.mxu0 %v1125_v47 }
 0x140   :  { %v766_v14 = vpop.f32.mrb[0].mxu0 }
 0x141   :  { %v767_v16 = vpop.f32.mrb[1].mxu0 }
 0x142   :  { %v804_v17 = vpop.f32.mrb[0].mxu1  ;;  %v768_v18 = vadd.f32 %v767_v16, %v766_v14 }
 0x143   :  { %v805_v19 = vpop.f32.mrb[1].mxu1 }
 0x144   :  { %v806_v20 = vadd.f32 %v805_v19, %v804_v17  ;;  %v275_v21 = vadd.f32 %v768_v18, %v729_v15  ;;  %v769_v22 = vpop.f32.mrb[2].mxu0 }
 0x145   :  { %v770_v23 = vpop.f32.mrb[3].mxu0 }
 0x146   :  { %v807_v24 = vpop.f32.mrb[2].mxu1  ;;  %v350_v25 = vadd.f32 %v806_v20, %v275_v21  ;;  %v771_v26 = vadd.f32 %v770_v23, %v769_v22 }
 0x147   :  { %v808_v27 = vpop.f32.mrb[3].mxu1 }
 0x148   :  { %v809_v28 = vadd.f32 %v808_v27, %v807_v24  ;;  %v280_v29 = vadd.f32 %v771_v26, %v729_v15 }
 0x14a   :  { %v894_v30 = vpop.f32.mrb[4].mxu1  ;;  %v355_v31 = vadd.f32 %v809_v28, %v280_v29 }
 0x14b   :  { %v499_v32 = vpop.f32.mrb[5].mxu1 }
 0x160   :  { %v842_v33 = vpop.f32.mrb[4].mxu0 }
 0x161   :  { %v843_v34 = vpop.f32.mrb[5].mxu0 }
 0x162   :  { %v844_v35 = vadd.f32 %v843_v34, %v842_v33 }
 0x164   :  { %v845_v36 = vpop.f32.mrb[6].mxu0  ;;  %v425_v37 = vadd.f32 %v844_v35, %v350_v25 }
 0x165   :  { %v846_v38 = vpop.f32.mrb[7].mxu0 }
 0x166   :  { %v847_v39 = vadd.f32 %v846_v38, %v845_v36  ;;  %v500_v40 = vadd.f32 %v499_v32, %v425_v37 }
 0x168   :  { %v430_v41 = vadd.f32 %v847_v39, %v355_v31  ;;  %v508_v42 = vmax.f32 %v500_v40, 0.0 }
 0x16a   :  { %v505_v43 = vadd.f32 %v894_v30, %v430_v41  ;;  %927 = vmatprep.mubr.f32.mxu1 %v508_v42 }
 0x16c   :  { %v509_v44 = vmax.f32 %v505_v43, 0.0 }
 0x16e   :  { %928 = vmatmul.mubr.f32.vlgmr.msra.gmra.mrb[6].mxu1 %v509_v44 }
 0x241   :  { %v929_v49 = vpop.f32.mrb[6].mxu1 }
 0x242   :  { %v605_v50 = vadd.f32 %v929_v49, %v732_v48  ;;  %v599_v51 = vpop.f32.mrb[7].mxu1 }
 0x243   :  { %v600_v52 = vadd.f32 %v732_v48, %v599_v51 }
 0x244   :  { %v609_v54 = vmax.f32 %v605_v50, 0.0 }
 0x245   :  { %v608_v53 = vmax.f32 %v600_v52, 0.0 }
 0x247   :  { %962 = vmatprep.mubr.f32.mxu0 %v608_v53 }
 0x248   :  { %963 = vmatmul.mubr.f32.vlgmr.msra.gmra.mrb[8].mxu0 %v609_v54 }
 0x31b   :  { %v964_v56 = vpop.f32.mrb[8].mxu0 }
 0x31c   :  { %v705_v57 = vadd.f32 %v964_v56, %v733_v55  ;;  %v699_v58 = vpop.f32.mrb[9].mxu0 }
 0x31d   :  { %v700_v59 = vadd.f32 %v733_v55, %v699_v58 }
 0x31e   :  { %709 = vst [vmem:[#allocation10 + $0x8] sm:$0xff] %v705_v57 }
 0x31f   :  { %708 = vst [vmem:[#allocation10] sm:$0xff] %v700_v59 }
 0x320   :  { %1237 = shalt.err (!%p1234_p8)
}
 0x321   :  { %s1238_s6 = scalar_lea.hbm %s1400_s7, 256 }
 0x322   :  { %p1239_p9 = scmp.ne.s32.totalorder %s1400_s7, %s1238_s6  ;;  %p1242_p10 = scmp.lt.u32.totalorder %s1238_s6, %s1400_s7 }
 0x324   :  { %p1244_p11 = pnand %p1242_p10, %p1239_p9 }
 0x326   :  { %1247 = shalt.err (!%p1244_p11)
}
 0x327   :  { %721 = dma.vmem_to_hbm [thread:$0]  %s716_s10, 256, %s1400_s7, [#allocation4], %s1257_s11, %s1257_s11, %s1258_s12  }
 0x328   :  { %1254 = dma.done.wait [#allocation4], 256  }
 0x329   :  { %1255 = vsyncadd [#allocation4], 4294967040 }
 0x32a   :  { %725 = vsyncpa [#allocation3], 1 }
 0x32b   :  { %726 = vsyncpa [#allocation6], 1 }
 0x32c   :  { %727 = vsyncpa [#allocation9], 1 }
 0x32d   :  { %728 = vsyncpa [#allocation4], 1 }

</bundles_post_ra>
